<compile_context>
chip_gen: v7x
topology: tpu7x:2x2x1
jax: 0.10.0
libtpu: 0.0.40
codegen_flags: <defaults>
</compile_context>

<pallas_src>
import functools

import jax
import jax.numpy as jnp
from jax.experimental import pallas as pl
from jax.experimental.pallas import tpu as pltpu

EPS = 1e-5

# ------------------------------ byte budgets ---------------------------------
_VMEM_LIMIT_BYTES = 48 * 1024 * 1024   # scoped VMEM: > v5e default (16 MiB),
                                       # < v7x physical (64 MiB)
_BLOCK_CAP_BYTES = 4 * 1024 * 1024     # per-block cap: 2x in + 2x out <= 16 MiB


# ----------------------------- tile selection --------------------------------
def _sublane_quantum(dtype):
    """Native sublane packing quantum for the dtype (rows per vreg group)."""
    return {4: 8, 2: 16, 1: 32}.get(jnp.dtype(dtype).itemsize, 8)


def _divisor_multiples(dim, quantum, cap):
    """Divisors of `dim` that are multiples of `quantum` and <= cap, descending."""
    out = [t for t in range(quantum, min(dim, cap) + 1, quantum) if dim % t == 0]
    out.reverse()
    return out


def _channel_tile_candidates(C, quantum):
    """Legal channel (sublane) tiles, best first: multiples of the dtype packing
    quantum, else multiples of 8, else the full channel dim (always legal)."""
    cands = _divisor_multiples(C, quantum, C)
    if not cands and quantum != 8:
        cands = _divisor_multiples(C, 8, C)
    if not cands:
        cands = [C]
    return cands


def _prefer_two_blocks(C, cands, cb):
    """Keep >= 2 channel blocks when possible so v7x's two TensorCores both get
    work on the 'parallel' channel grid axis."""
    if C // cb >= 2:
        return cb
    for c in cands:
        if c <= cb and C // c >= 2:
            return c
    return cb


def _select_fused_cb(N, C, HW, itemsize, cq, cap):
    """Channel tile for the fused single-read path, or None if infeasible."""
    per_channel = N * HW * itemsize
    cands = _channel_tile_candidates(C, cq)
    feas = [c for c in cands if c * per_channel <= cap]
    if not feas:
        return None
    return _prefer_two_blocks(C, feas, feas[0])


def _select_tiled(N, C, HW, itemsize, cq, cap):
    """(nb, cb, thw) tiles for the two-pass streaming path."""
    # Lane tile: largest 128-multiple divisor of HW (up to 8192 lanes, within
    # the byte budget). Non-128-multiple HW -> full-extent lane block (legal);
    # the budget is then recovered via larger cb / nb.
    thw_cap = min(8192, max(128, cap // (8 * itemsize)))
    thw_opts = _divisor_multiples(HW, 128, thw_cap)
    thw = thw_opts[0] if thw_opts else HW

    cands = _channel_tile_candidates(C, cq)
    c_budget = max(cands[-1], cap // max(1, thw * itemsize))
    feas = [c for c in cands if c <= min(64, c_budget)]
    cb = feas[0] if feas else cands[-1]
    cb = _prefer_two_blocks(C, cands, cb)

    n_budget = max(1, cap // max(1, cb * thw * itemsize))
    nb = 1
    for t in range(min(N, 32, n_budget), 0, -1):
        if N % t == 0:
            nb = t
            break
    return nb, cb, thw


# --------------------------------- kernels ------------------------------------
def _fused_kernel(x_ref, gamma_ref, beta_ref, o_ref, *, inv_m, eps):
    # x_ref / o_ref: (N, cb, HW) — an entire channel block is resident, so x is
    # read from HBM exactly once (1 read + 1 write total).
    x = x_ref[...].astype(jnp.float32)
    s = jnp.sum(jnp.sum(x, axis=2, keepdims=True), axis=0)        # (cb, 1)
    sq = jnp.sum(jnp.sum(x * x, axis=2, keepdims=True), axis=0)   # (cb, 1)
    mean = s * inv_m
    var = jnp.maximum(sq * inv_m - mean * mean, 0.0)              # clamp: rounding can go < 0
    inv = jax.lax.rsqrt(var + eps)
    scale = gamma_ref[...].astype(jnp.float32) * inv              # (cb, 1)
    shift = beta_ref[...].astype(jnp.float32) - mean * scale
    o_ref[...] = (x * scale[None, :, :] + shift[None, :, :]).astype(o_ref.dtype)


def _stats_kernel(x_ref, acc_ref):
    # x_ref: (nb, cb, thw) tile; acc_ref: (cb, 2) resident accumulator
    # (column 0 = sum, column 1 = sum of squares).
    @pl.when(jnp.logical_and(pl.program_id(1) == 0, pl.program_id(2) == 0))
    def _():
        acc_ref[...] = jnp.zeros_like(acc_ref)

    x = x_ref[...].astype(jnp.float32)
    # lane reduction first (XLU), then the leading batch-tile axis.
    s = jnp.sum(jnp.sum(x, axis=2, keepdims=True), axis=0)        # (cb, 1)
    sq = jnp.sum(jnp.sum(x * x, axis=2, keepdims=True), axis=0)   # (cb, 1)
    acc_ref[:, 0:1] += s
    acc_ref[:, 1:2] += sq


def _norm_kernel(x_ref, scale_ref, shift_ref, o_ref):
    # x_ref / o_ref: (nb, cb, thw); scale_ref / shift_ref: (cb, 1).
    x = x_ref[...].astype(jnp.float32)
    scale = scale_ref[...][None, :, :]                            # (1, cb, 1)
    shift = shift_ref[...][None, :, :]
    o_ref[...] = (x * scale + shift).astype(o_ref.dtype)


# --------------------------------- wrapper -------------------------------------
def rn_batch_normalization_forward(x_nchw, gamma, beta, eps=EPS,
                                   force_two_pass=False, max_block_bytes=None):
    """x_nchw: (N, C, H, W). gamma, beta: (C,). Returns (N, C, H, W)."""
    N, C, H, W = x_nchw.shape
    HW = H * W
    M = N * HW                                    # elements per channel
    itemsize = jnp.dtype(x_nchw.dtype).itemsize
    cq = _sublane_quantum(x_nchw.dtype)
    cap = max_block_bytes or _BLOCK_CAP_BYTES

    x3 = x_nchw.reshape(N, C, HW)                 # free reshape, NCHW-native layout
    gamma2 = gamma.reshape(C, 1).astype(jnp.float32)
    beta2 = beta.reshape(C, 1).astype(jnp.float32)

    # ----- fused single-read fast path -----------------------------------------
    fused_cb = None if force_two_pass else _select_fused_cb(N, C, HW, itemsize, cq, cap)
    if fused_cb is not None:
        cb = fused_cb
        x_spec = pl.BlockSpec((N, cb, HW), lambda ci: (0, ci, 0))
        ch_spec = pl.BlockSpec((cb, 1), lambda ci: (ci, 0))
        out3 = pl.pallas_call(
            functools.partial(_fused_kernel, inv_m=1.0 / M, eps=eps),
            out_shape=jax.ShapeDtypeStruct((N, C, HW), x_nchw.dtype),
            grid=(C // cb,),
            in_specs=[x_spec, ch_spec, ch_spec],
            out_specs=x_spec,
            compiler_params=pltpu.CompilerParams(
                dimension_semantics=("parallel",),
                vmem_limit_bytes=_VMEM_LIMIT_BYTES),
        )(x3, gamma2, beta2)
        return out3.reshape(N, C, H, W)

    # ----- two-pass streaming path ----------------------------------------------
    nb, cb, thw = _select_tiled(N, C, HW, itemsize, cq, cap)
    grid = (C // cb, N // nb, HW // thw)          # reduction axes last

    x_spec = pl.BlockSpec((nb, cb, thw), lambda ci, ni, ti: (ni, ci, ti))
    ch_spec = pl.BlockSpec((cb, 1), lambda ci, ni, ti: (ci, 0))
    acc_spec = pl.BlockSpec((cb, 2), lambda ci, ni, ti: (ci, 0))

    # pass 1: per-channel [sum, sumsq] accumulated in a resident (cb, 2) block.
    stats = pl.pallas_call(
        _stats_kernel,
        out_shape=jax.ShapeDtypeStruct((C, 2), jnp.float32),
        grid=grid,
        in_specs=[x_spec],
        out_specs=acc_spec,
        compiler_params=pltpu.CompilerParams(
            dimension_semantics=("parallel", "arbitrary", "arbitrary"),
            vmem_limit_bytes=_VMEM_LIMIT_BYTES),
    )(x3)

    # O(C) epilogue: fold stats + affine into one scale/shift per channel.
    mean = stats[:, 0:1] / M
    var = jnp.maximum(stats[:, 1:2] / M - mean * mean, 0.0)       # biased var, clamped
    inv = jax.lax.rsqrt(var + eps)
    scale = gamma2 * inv                                          # (C, 1)
    shift = beta2 - mean * scale

    # pass 2: out = x * scale + shift (one FMA per element).
    out3 = pl.pallas_call(
        _norm_kernel,
        out_shape=jax.ShapeDtypeStruct((N, C, HW), x_nchw.dtype),
        grid=grid,
        in_specs=[x_spec, ch_spec, ch_spec],
        out_specs=x_spec,
        compiler_params=pltpu.CompilerParams(
            dimension_semantics=("parallel", "parallel", "parallel"),
            vmem_limit_bytes=_VMEM_LIMIT_BYTES),
    )(x3, scale, shift)

    return out3.reshape(N, C, H, W)               # free reshape back to NCHW


if __name__ == "__main__":
    key = jax.random.PRNGKey(0)
    kx, kg, kb, kx2, kg2, kb2 = jax.random.split(key, 6)

    def _ref(x, g, b):
        c = x.shape[1]
        mean = jnp.mean(x, axis=(0, 2, 3), keepdims=True)
        var = jnp.mean((x - mean) ** 2, axis=(0, 2, 3), keepdims=True)
        return (x - mean) / jnp.sqrt(var + EPS) * g.reshape(1, c, 1, 1) \
            + b.reshape(1, c, 1, 1)

    # --- primary test (module-consistent small shape): fused single-read path.
    N, C, H, W = 2, 4, 16, 16
    x = jax.random.normal(kx, (N, C, H, W), dtype=jnp.float32)
    gamma = 1.0 + 0.1 * jax.random.normal(kg, (C,), dtype=jnp.float32)
    beta = 0.1 * jax.random.normal(kb, (C,), dtype=jnp.float32)

    out = jax.block_until_ready(rn_batch_normalization_forward(x, gamma, beta))
    ref = _ref(x, gamma, beta)
    assert out.shape == (N, C, H, W)
    err = float(jnp.max(jnp.abs(out - ref)))
    assert jnp.allclose(out, ref, atol=1e-4, rtol=1e-4), err

    # --- secondary test: exercise the two-pass streaming path with a
    # multi-step reduction grid by shrinking the block byte budget.
    N2, C2, H2, W2 = 2, 8, 32, 32
    x2 = jax.random.normal(kx2, (N2, C2, H2, W2), dtype=jnp.float32)
    gamma2 = 1.0 + 0.1 * jax.random.normal(kg2, (C2,), dtype=jnp.float32)
    beta2 = 0.1 * jax.random.normal(kb2, (C2,), dtype=jnp.float32)

    out2 = jax.block_until_ready(
        rn_batch_normalization_forward(x2, gamma2, beta2,
                                       force_two_pass=True,
                                       max_block_bytes=16 * 1024))
    ref2 = _ref(x2, gamma2, beta2)
    err2 = float(jnp.max(jnp.abs(out2 - ref2)))
    assert jnp.allclose(out2, ref2, atol=1e-4, rtol=1e-4), err2

    print("KERNEL_OK")
</pallas_src>

<mosaic_0001>
module attributes {stable_mosaic.version = 11 : i64} {
  func.func @_fused_kernel(%arg0: i32, %arg1: memref<2x4x256xf32, #tpu.memory_space<vmem>>, %arg2: memref<4x1xf32, #tpu.memory_space<vmem>>, %arg3: memref<4x1xf32, #tpu.memory_space<vmem>>, %arg4: memref<2x4x256xf32, #tpu.memory_space<vmem>>) attributes {dimension_semantics = [#tpu.dimension_semantics<parallel>], iteration_bounds = array<i64: 1>, scalar_prefetch = 0 : i64, scratch_operands = 0 : i64, tpu.core_type = #tpu.core_type<tc>, window_params = [{transform_indices = @transform_0, window_bounds = array<i64: 2, 4, 256>}, {transform_indices = @transform_1, window_bounds = array<i64: 4, 1>}, {transform_indices = @transform_2, window_bounds = array<i64: 4, 1>}, {transform_indices = @transform_3, window_bounds = array<i64: 2, 4, 256>}]} {
    %c0 = arith.constant 0 : index
    %c0_0 = arith.constant 0 : index
    %c0_1 = arith.constant 0 : index
    %0 = vector.load %arg1[%c0, %c0_0, %c0_1] : memref<2x4x256xf32, #tpu.memory_space<vmem>>, vector<2x4x256xf32>
    %cst = arith.constant dense<0.000000e+00> : vector<2x4xf32>
    %1 = vector.multi_reduction <add>, %0, %cst [2] : vector<2x4x256xf32> to vector<2x4xf32>
    %2 = vector.shape_cast %1 : vector<2x4xf32> to vector<2x4x1xf32>
    %cst_2 = arith.constant dense<0.000000e+00> : vector<4x1xf32>
    %3 = vector.multi_reduction <add>, %2, %cst_2 [0] : vector<2x4x1xf32> to vector<4x1xf32>
    %4 = arith.mulf %0, %0 : vector<2x4x256xf32>
    %cst_3 = arith.constant dense<0.000000e+00> : vector<2x4xf32>
    %5 = vector.multi_reduction <add>, %4, %cst_3 [2] : vector<2x4x256xf32> to vector<2x4xf32>
    %6 = vector.shape_cast %5 : vector<2x4xf32> to vector<2x4x1xf32>
    %cst_4 = arith.constant dense<0.000000e+00> : vector<4x1xf32>
    %7 = vector.multi_reduction <add>, %6, %cst_4 [0] : vector<2x4x1xf32> to vector<4x1xf32>
    %cst_5 = arith.constant 0.001953125 : f32
    %8 = vector.broadcast %cst_5 : f32 to vector<4x1xf32>
    %9 = arith.mulf %3, %8 : vector<4x1xf32>
    %cst_6 = arith.constant 0.001953125 : f32
    %10 = vector.broadcast %cst_6 : f32 to vector<4x1xf32>
    %11 = arith.mulf %7, %10 : vector<4x1xf32>
    %12 = arith.mulf %9, %9 : vector<4x1xf32>
    %13 = arith.subf %11, %12 : vector<4x1xf32>
    %cst_7 = arith.constant 0.000000e+00 : f32
    %14 = vector.broadcast %cst_7 : f32 to vector<4x1xf32>
    %15 = arith.maximumf %13, %14 : vector<4x1xf32>
    %cst_8 = arith.constant 9.99999974E-6 : f32
    %16 = vector.broadcast %cst_8 : f32 to vector<4x1xf32>
    %17 = arith.addf %15, %16 : vector<4x1xf32>
    %18 = math.rsqrt %17 : vector<4x1xf32>
    %c0_9 = arith.constant 0 : index
    %c0_10 = arith.constant 0 : index
    %19 = vector.load %arg2[%c0_9, %c0_10] : memref<4x1xf32, #tpu.memory_space<vmem>>, vector<4x1xf32>
    %20 = arith.mulf %19, %18 : vector<4x1xf32>
    %c0_11 = arith.constant 0 : index
    %c0_12 = arith.constant 0 : index
    %21 = vector.load %arg3[%c0_11, %c0_12] : memref<4x1xf32, #tpu.memory_space<vmem>>, vector<4x1xf32>
    %22 = arith.mulf %9, %20 : vector<4x1xf32>
    %23 = arith.subf %21, %22 : vector<4x1xf32>
    %24 = vector.shape_cast %20 : vector<4x1xf32> to vector<1x4x1xf32>
    %25 = vector.broadcast %24 : vector<1x4x1xf32> to vector<2x4x256xf32>
    %26 = arith.mulf %0, %25 : vector<2x4x256xf32>
    %27 = vector.shape_cast %23 : vector<4x1xf32> to vector<1x4x1xf32>
    %28 = vector.broadcast %27 : vector<1x4x1xf32> to vector<2x4x256xf32>
    %29 = arith.addf %26, %28 : vector<2x4x256xf32>
    %c0_13 = arith.constant 0 : index
    %c0_14 = arith.constant 0 : index
    %c0_15 = arith.constant 0 : index
    %30 = vector.load %arg4[%c0_13, %c0_14, %c0_15] : memref<2x4x256xf32, #tpu.memory_space<vmem>>, vector<2x4x256xf32>
    tpu.vector_store %arg4[%c0_13, %c0_14, %c0_15], %29 {strides = array<i32>} : memref<2x4x256xf32, #tpu.memory_space<vmem>>, vector<2x4x256xf32>,
    return
  }
  func.func @transform_0(%arg0: i32) -> (i32, i32, i32) {
    %c0_i32 = arith.constant 0 : i32
    %c0_i32_0 = arith.constant 0 : i32
    %c0_i32_1 = arith.constant 0 : i32
    return %c0_i32, %arg0, %c0_i32_0 : i32, i32, i32
  }
  func.func @transform_1(%arg0: i32) -> (i32, i32) {
    %c0_i32 = arith.constant 0 : i32
    %c0_i32_0 = arith.constant 0 : i32
    return %arg0, %c0_i32 : i32, i32
  }
  func.func @transform_2(%arg0: i32) -> (i32, i32) {
    %c0_i32 = arith.constant 0 : i32
    %c0_i32_0 = arith.constant 0 : i32
    return %arg0, %c0_i32 : i32, i32
  }
  func.func @transform_3(%arg0: i32) -> (i32, i32, i32) {
    %c0_i32 = arith.constant 0 : i32
    %c0_i32_0 = arith.constant 0 : i32
    %c0_i32_1 = arith.constant 0 : i32
    return %c0_i32, %arg0, %c0_i32_0 : i32, i32, i32
  }
}

</mosaic_0001>

<bundles_post_ra>
// kernel: tpu_custom_call.1
= control target key start
LH: loop header
LB: loop body
LE: loop exit
PB: predicated region body
PF: predicated region fallthrough
CT: control target
= control target key end

     0   :  { %8 = vsyncpa [#allocation3], 0  ;;  %s281_s0 = inlined_call_operand.hbm [shape: f32[2,4,256], index: 0, kind: input, shape index: {}]   ;;  %s282_s1 = inlined_call_operand.vmem [shape: f32[4,1], index: 1, kind: input, shape index: {}]   ;;  %s283_s2 = inlined_call_operand.vmem [shape: f32[4,1], index: 2, kind: input, shape index: {}]   ;;  %s284_s3 = inlined_call_operand.hbm [shape: f32[2,4,256], index: 3, kind: output, shape index: {}]  }
   0x1   :  { %9 = vsyncpa [#allocation4], 0  ;;  %s191_s12 = smov [#allocation2]   ;;  %s143_s16 = scalar_lea.hbm %s281_s0, 256 }
   0x2   :  { %s15_s13 = sshll.u32 %s191_s12, 4  ;;  %p144_p0 = scmp.ne.s32.totalorder %s281_s0, %s143_s16  ;;  %s16_s13 = int_to_ptr.vmem [resolvable:$true] %s15_s13 }
   0x3   :  { %p147_p1 = scmp.lt.u32.totalorder %s143_s16, %s281_s0 }
   0x5   :  { %p149_p2 = pnand %p147_p1, %p144_p0 }
   0x7   :  { %152 = shalt.err (!%p149_p2)
}
   0x8   :  { %s153_s21 = scalar_lea.vmem %s16_s13, 256  ;;  %p158_p4 = scmp.lt.s32.totalorder %s16_s13, %s16_s13 }
   0x9   :  { %p154_p3 = scmp.ne.s32.totalorder %s16_s13, %s153_s21  ;;  %p159_p5 = scmp.lt.s32.totalorder %s153_s21, %s153_s21 }
   0xb   :  { %p160_p6 = por %p159_p5, %p158_p4 }
   0xd   :  { %p161_p7 = pnand %p160_p6, %p154_p3 }
   0xf   :  { %164 = shalt.err (!%p161_p7)
}
  0x10   :  { %s192_s22 = smov 128   ;;  %s193_s23 = smov 8  }
  0x11   :  { %21 = dma.hbm_to_vmem [thread:$0]  %s281_s0, 256, %s16_s13, [#allocation3], %s192_s22, %s192_s22, %s193_s23  }
  0x12   :  { %187 = dma.done.wait [#allocation3], 256  }
  0x13   :  { %188 = vsyncadd [#allocation3], 4294967040  ;;  %vm37_vm0 = vcmask 1043456   ;;  %v232_v0 = vld [vmem:[#allocation2] sm:$0xff]  ;;  %v234_v1 = vld [vmem:[#allocation2 + $0x8] sm:$0xff]  ;;  %v194_v20 = vmov 0   ;;  %v91_v45 = vlaneseq }
  0x14   :  { %v33_v2 = vcombine.high %v232_v0, %v232_v0  ;;  %v38_v3 = vsel %vm37_vm0, %v232_v0, 0.0  ;;  %v51_v4 = vmul.f32 %v232_v0, %v232_v0  ;;  %v34_v5 = vcombine.high %v234_v1, %v234_v1  ;;  %137 = vset.pattern.permute.xlu0 %v194_v20  ;;  %138 = vset.pattern.permute.xlu1 %v194_v20  ;;  %v79_v37 = vld [vmem:[%s282_s1] sm:$0xf]  ;;  %s196_s1 = smov [#allocation5]  }
  0x15   :  { %v43_v6 = vsel %vm37_vm0, %v234_v1, 0.0  ;;  %v52_v7 = vmul.f32 %v234_v1, %v234_v1  ;;  %v81_v40 = vld [vmem:[%s283_s2] sm:$0xf]  ;;  %v195_v43 = vmov 839922192   ;;  %v92_v47 = vshrl.u32 %v91_v45, 7 }
  0x16   :  { %v39_v8 = vsel %vm37_vm0, %v33_v2, 0.0  ;;  %v55_v9 = vcombine.high %v51_v4, %v51_v4  ;;  %v59_v10 = vsel %vm37_vm0, %v51_v4, 0.0  ;;  %v44_v11 = vsel %vm37_vm0, %v34_v5, 0.0  ;;  %s119_s29 = sshll.u32 %s196_s1, 4  ;;  %s120_s29 = int_to_ptr.vmem [resolvable:$true] %s119_s29 }
  0x17   :  { %v40_v12 = vadd.f32 %v39_v8, %v38_v3  ;;  %v56_v13 = vcombine.high %v52_v7, %v52_v7  ;;  %v64_v15 = vsel %vm37_vm0, %v52_v7, 0.0  ;;  %v45_v17 = vadd.f32 %v44_v11, %v43_v6  ;;  %s165_s2 = scalar_lea.vmem %s120_s29, 256  ;;  %p170_p9 = scmp.lt.s32.totalorder %s120_s29, %s120_s29 }
  0x18   :  { %v60_v14 = vsel %vm37_vm0, %v55_v9, 0.0  ;;  %v89_v44 = vunpack.c.l.s4 %v195_v43  ;;  %p166_p8 = scmp.ne.s32.totalorder %s120_s29, %s165_s2  ;;  %p171_p10 = scmp.lt.s32.totalorder %s165_s2, %s165_s2 }
  0x19   :  { %41 = vadd.xlane.f32.xlu0 %v40_v12  ;;  %v61_v16 = vadd.f32 %v60_v14, %v59_v10  ;;  %v65_v18 = vsel %vm37_vm0, %v56_v13, 0.0 }
  0x1a   :  { %v66_v19 = vadd.f32 %v65_v18, %v64_v15  ;;  %v90_v46 = vunpack.c.0.s8 %v89_v44  ;;  %p172_p11 = por %p171_p10, %p170_p9 }
  0x1b   :  { %62 = vadd.xlane.f32.xlu1 %v61_v16 }
  0x1c   :  { %v93_v48 = vsub.s32 %v90_v46, %v92_v47  ;;  %p173_p12 = pnand %p172_p11, %p166_p8 }
  0x1d   :  { %46 = vadd.xlane.f32.xlu0 %v45_v17 }
  0x1f   :  { %67 = vadd.xlane.f32.xlu1 %v66_v19 }
  0xa6   :  { %v42_v21 = vpop.xlane.xlu0 %41 }
  0xa7   :  { %v48_v24 = vsel %vm37_vm0, %v42_v21, 0.0 }
  0xa8   :  { %v63_v22 = vpop.xlane.xlu1 %62 }
  0xa9   :  { %v69_v28 = vsel %vm37_vm0, %v63_v22, 0.0 }
  0xaa   :  { %v47_v23 = vpop.xlane.xlu0 %46 }
  0xab   :  { %v49_v25 = vsel %vm37_vm0, %v47_v23, 0.0 }
  0xac   :  { %v50_v26 = vadd.f32 %v49_v25, %v48_v24  ;;  %v68_v27 = vpop.xlane.xlu1 %67 }
  0xad   :  { %v70_v29 = vsel %vm37_vm0, %v68_v27, 0.0 }
  0xae   :  { %v72_v30 = vmul.f32 0.001953125, %v50_v26  ;;  %v71_v31 = vadd.f32 %v70_v29, %v69_v28 }
  0xb0   :  { %v74_v32 = vmul.f32 %v72_v30, %v72_v30  ;;  %v73_v33 = vmul.f32 0.001953125, %v71_v31 }
  0xb2   :  { %v75_v34 = vsub.f32 %v73_v33, %v74_v32 }
  0xb4   :  { %v76_v35 = vmax.f32 %v75_v34, 0.0 }
  0xb6   :  { %v77_v36 = vadd.f32 1e-05, %v76_v35 }
  0xb8   :  { %141 = vrsqrt.f32 %v77_v36 }
  0xc2   :  { %v142_v38 = vpop.eup %141 }
  0xc3   :  { %v80_v39 = vmul.f32 %v142_v38, %v79_v37 }
  0xc5   :  { %86 = vperm.xlu0 %137, %v80_v39   ;;  %v82_v41 = vmul.f32 %v80_v39, %v72_v30 }
  0xc7   :  { %v83_v42 = vsub.f32 %v81_v40, %v82_v41 }
  0xc9   :  { %100 = vperm.xlu1 %138, %v83_v42  }
 0x144   :  { %v87_v49 = vpop.permute.xlu0 %86 }
 0x145   :  { %v94_v50 = vrot.slane %v87_v49, %v93_v48 }
 0x147   :  { %v96_v52 = vmul.f32 %v94_v50, %v232_v0  ;;  %v97_v53 = vmul.f32 %v94_v50, %v234_v1 }
 0x148   :  { %v101_v51 = vpop.permute.xlu1 %100 }
 0x149   :  { %v108_v54 = vrot.slane %v101_v51, %v93_v48 }
 0x14b   :  { %v110_v55 = vadd.f32 %v108_v54, %v96_v52  ;;  %v111_v56 = vadd.f32 %v108_v54, %v97_v53 }
 0x14d   :  { %112 = vst [vmem:[#allocation5] sm:$0xff] %v110_v55  ;;  %113 = vst [vmem:[#allocation5 + $0x8] sm:$0xff] %v111_v56 }
 0x14e   :  { %176 = shalt.err (!%p173_p12)
}
 0x14f   :  { %s177_s5 = scalar_lea.hbm %s284_s3, 256 }
 0x150   :  { %p178_p13 = scmp.ne.s32.totalorder %s284_s3, %s177_s5  ;;  %p181_p0 = scmp.lt.u32.totalorder %s177_s5, %s284_s3 }
 0x152   :  { %p183_p1 = pnand %p181_p0, %p178_p13 }
 0x154   :  { %186 = shalt.err (!%p183_p1)
}
 0x155   :  { %125 = dma.vmem_to_hbm [thread:$0]  %s120_s29, 256, %s284_s3, [#allocation4], %s192_s22, %s192_s22, %s193_s23  }
 0x156   :  { %189 = dma.done.wait [#allocation4], 256  }
 0x157   :  { %190 = vsyncadd [#allocation4], 4294967040 }
 0x158   :  { %129 = vsyncpa [#allocation3], 1 }
 0x159   :  { %130 = vsyncpa [#allocation4], 1 }

</bundles_post_ra>
